<compile_context>
chip_gen: v6e
topology: v6e:2x2x1
jax: 0.10.0
libtpu: 0.0.40
codegen_flags: <defaults>
</compile_context>

<pallas_src>
import math
from functools import partial

import jax
import jax.numpy as jnp
from jax import lax
from jax.experimental import pallas as pl
from jax.experimental.pallas import tpu as pltpu


def _causal_mha_kernel(q_ref, k_ref, v_ref, o_ref, *, d_out, tq):
    """One (batch, q-tile) grid step: causal attention for all heads.

    q_ref: (1, H, TQ, d_out)  bf16  -- pre-projected, pre-scaled queries
    k_ref: (1, H, T,  d_out)  bf16  -- pre-projected keys   (full sequence)
    v_ref: (1, H, T,  d_out)  bf16  -- pre-projected values (full sequence)
    o_ref: (1, TQ, H*d_out)   f32   -- final lane-dense output layout
    """
    qi = pl.program_id(1)
    num_heads = q_ref.shape[1]
    t_kv = k_ref.shape[2]

    q = q_ref[0]                      # (H, TQ, d_out) bf16
    k = k_ref[0]                      # (H, T,  d_out) bf16
    v = v_ref[0]                      # (H, T,  d_out) bf16

    # Head-batched scores on the MXU, f32 accumulation; contraction over
    # d_out so no explicit transpose of k is needed.
    s = jnp.einsum("hqd,hkd->hqk", q, k,
                   preferred_element_type=jnp.float32)         # (H, TQ, T)

    # Causal mask for this q-tile: global row index = qi*TQ + local row.
    row = qi * tq + lax.broadcasted_iota(jnp.int32, (1, tq, t_kv), 1)
    col = lax.broadcasted_iota(jnp.int32, (1, tq, t_kv), 2)
    s = jnp.where(col <= row, s, -jnp.inf)

    # Numerically stable softmax: f32 VPU math, EUP exp + approx reciprocal.
    s = s - jnp.max(s, axis=-1, keepdims=True)
    p = jnp.exp(s)
    p = p * pl.reciprocal(jnp.sum(p, axis=-1, keepdims=True), approx=True)

    # dropout on attention weights: identity (eval mode)

    ctx = jnp.einsum("hqk,hkd->hqd", p.astype(jnp.bfloat16), v,
                     preferred_element_type=jnp.float32)       # (H, TQ, d_out)

    # Per-head static-slice stores into the lane-dense output block.
    # (H is small here; switch to lax.fori_loop if H grows beyond ~4.)
    for h in range(num_heads):
        o_ref[0, :, pl.ds(h * d_out, d_out)] = ctx[h].astype(o_ref.dtype)


def multi_head_attention_wrapper(x, wq, wk, wv, *, q_tile=256):
    """x: (B, T, d_in); wq/wk/wv: (H, d_in, d_out). Returns (B, T, H*d_out).

    q_tile: 256 is a good default for v6e/v7x; use 128 on v5e.
    """
    B, T, d_in = x.shape
    H, _, d_out = wq.shape

    tq = T if T <= q_tile else q_tile
    assert T % tq == 0, "sequence length must be a multiple of the q tile"
    nq = T // tq

    # Hoisted one-time projections (plain XLA matmuls, f32), head axis
    # leading; 1/sqrt(d_out) folded into Wq.  Results cast to bf16 for the
    # MXU inside the kernel.
    wq_scaled = wq * (1.0 / math.sqrt(d_out))
    q = jnp.einsum("btd,hde->bhte", x, wq_scaled).astype(jnp.bfloat16)
    k = jnp.einsum("btd,hde->bhte", x, wk).astype(jnp.bfloat16)
    v = jnp.einsum("btd,hde->bhte", x, wv).astype(jnp.bfloat16)

    # VMEM budget: double-buffered bf16 input blocks + f32 output blocks +
    # f32 intermediates (scores, probs, ctx); 1.5x margin, capped well under
    # v7x's 64 MiB physical VMEM.
    in_bytes = 2 * 2 * (H * tq * d_out + 2 * H * T * d_out)
    out_bytes = 2 * 4 * (tq * H * d_out)
    interm_bytes = 4 * (2 * H * tq * T + H * tq * d_out)
    needed = in_bytes + out_bytes + interm_bytes
    vmem_limit = min(max((needed * 3) // 2, 32 * 1024 * 1024),
                     48 * 1024 * 1024)

    kernel = partial(_causal_mha_kernel, d_out=d_out, tq=tq)

    # Output stays f32 to match the module; on v5e (single store slot,
    # narrow H*d_out) a bf16 output halves store/HBM-writeback pressure.
    return pl.pallas_call(
        kernel,
        out_shape=jax.ShapeDtypeStruct((B, T, H * d_out), jnp.float32),
        grid=(B, nq),
        in_specs=[
            pl.BlockSpec((1, H, tq, d_out), lambda b, i: (b, 0, i, 0)),   # q tile
            pl.BlockSpec((1, H, T, d_out), lambda b, i: (b, 0, 0, 0)),    # k (full seq)
            pl.BlockSpec((1, H, T, d_out), lambda b, i: (b, 0, 0, 0)),    # v (full seq)
        ],
        out_specs=pl.BlockSpec((1, tq, H * d_out), lambda b, i: (b, i, 0)),
        compiler_params=pltpu.CompilerParams(
            dimension_semantics=("parallel", "parallel"),
            vmem_limit_bytes=vmem_limit),
    )(q, k, v)


def _reference(x, wq, wk, wv):
    """Pure-JAX f32 reference matching the PyTorch module (eval mode)."""
    H, d_in, d_out = wq.shape
    T = x.shape[1]
    mask = jnp.triu(jnp.ones((T, T), bool), k=1)
    outs = []
    for h in range(H):
        q = x @ wq[h]
        k = x @ wk[h]
        v = x @ wv[h]
        s = jnp.einsum("btd,bsd->bts", q, k) / math.sqrt(d_out)
        s = jnp.where(mask[None], -jnp.inf, s)
        p = jax.nn.softmax(s, axis=-1)
        outs.append(jnp.einsum("bts,bsd->btd", p, v))
    return jnp.concatenate(outs, axis=-1)


if __name__ == "__main__":
    # Small shapes consistent with the module's forward.
    B, T, d_in, d_out, H = 2, 8, 32, 16, 2

    key = jax.random.PRNGKey(0)
    kx, kq, kk, kv = jax.random.split(key, 4)
    x = jax.random.normal(kx, (B, T, d_in), dtype=jnp.float32)
    # Deterministic per-head projection weights (Linear with qkv_bias=False).
    scale = 1.0 / math.sqrt(d_in)
    wq = jax.random.uniform(kq, (H, d_in, d_out), jnp.float32, -scale, scale)
    wk = jax.random.uniform(kk, (H, d_in, d_out), jnp.float32, -scale, scale)
    wv = jax.random.uniform(kv, (H, d_in, d_out), jnp.float32, -scale, scale)

    out = jax.block_until_ready(multi_head_attention_wrapper(x, wq, wk, wv))
    ref = _reference(x, wq, wk, wv)

    assert out.shape == (B, T, H * d_out), out.shape
    # bf16 MXU inputs + approx reciprocal -> looser tolerance than pure f32.
    err = float(jnp.max(jnp.abs(out - ref)))
    assert jnp.allclose(out, ref, atol=2e-2, rtol=2e-2), f"max abs err {err}"

    print("KERNEL_OK")
</pallas_src>

<mosaic_0001>
module attributes {stable_mosaic.version = 11 : i64} {
  func.func @_causal_mha_kernel(%arg0: i32, %arg1: i32, %arg2: memref<1x2x8x16xbf16, #tpu.memory_space<vmem>>, %arg3: memref<1x2x8x16xbf16, #tpu.memory_space<vmem>>, %arg4: memref<1x2x8x16xbf16, #tpu.memory_space<vmem>>, %arg5: memref<1x8x32xf32, #tpu.memory_space<vmem>>) attributes {dimension_semantics = [#tpu.dimension_semantics<parallel>, #tpu.dimension_semantics<parallel>], iteration_bounds = array<i64: 2, 1>, scalar_prefetch = 0 : i64, scratch_operands = 0 : i64, tpu.core_type = #tpu.core_type<tc>, window_params = [{transform_indices = @transform_0, window_bounds = array<i64: 1, 2, 8, 16>}, {transform_indices = @transform_1, window_bounds = array<i64: 1, 2, 8, 16>}, {transform_indices = @transform_2, window_bounds = array<i64: 1, 2, 8, 16>}, {transform_indices = @transform_3, window_bounds = array<i64: 1, 8, 32>}]} {
    %c0 = arith.constant 0 : index
    %c0_0 = arith.constant 0 : index
    %c0_1 = arith.constant 0 : index
    %c0_2 = arith.constant 0 : index
    %0 = vector.load %arg2[%c0, %c0_0, %c0_1, %c0_2] : memref<1x2x8x16xbf16, #tpu.memory_space<vmem>>, vector<1x2x8x16xbf16>
    %1 = vector.shape_cast %0 : vector<1x2x8x16xbf16> to vector<2x8x16xbf16>
    %c0_3 = arith.constant 0 : index
    %c0_4 = arith.constant 0 : index
    %c0_5 = arith.constant 0 : index
    %c0_6 = arith.constant 0 : index
    %2 = vector.load %arg3[%c0_3, %c0_4, %c0_5, %c0_6] : memref<1x2x8x16xbf16, #tpu.memory_space<vmem>>, vector<1x2x8x16xbf16>
    %3 = vector.shape_cast %2 : vector<1x2x8x16xbf16> to vector<2x8x16xbf16>
    %c0_7 = arith.constant 0 : index
    %c0_8 = arith.constant 0 : index
    %c0_9 = arith.constant 0 : index
    %c0_10 = arith.constant 0 : index
    %4 = vector.load %arg4[%c0_7, %c0_8, %c0_9, %c0_10] : memref<1x2x8x16xbf16, #tpu.memory_space<vmem>>, vector<1x2x8x16xbf16>
    %5 = vector.shape_cast %4 : vector<1x2x8x16xbf16> to vector<2x8x16xbf16>
    "tpu.trace_start"() <{level = 10 : i32, message = "hqd,hkd->hqk"}> : () -> ()
    %cst = arith.constant dense<0.000000e+00> : vector<2x8x8xf32>
    %6 = tpu.matmul %1, %3, %cst {dimension_numbers = #tpu.dot_dimension_numbers<[2], [2], [1], [1], [0, 0, 0, 1, 1, 1], [0], [0]>} : vector<2x8x16xbf16>, vector<2x8x16xbf16>, vector<2x8x8xf32> -> vector<2x8x8xf32>
    "tpu.trace_stop"() : () -> ()
    %c8_i32 = arith.constant 8 : i32
    %7 = arith.muli %arg1, %c8_i32 : i32
    %8 = tpu.iota {dimensions = array<i32: 1>} : vector<1x8x8xi32>
    %9 = vector.broadcast %7 : i32 to vector<1x8x8xi32>
    %10 = arith.addi %9, %8 : vector<1x8x8xi32>
    %11 = tpu.iota {dimensions = array<i32: 2>} : vector<1x8x8xi32>
    %12 = arith.cmpi sle, %11, %10 : vector<1x8x8xi32>
    %cst_11 = arith.constant 0xFF800000 : f32
    %13 = vector.shape_cast %12 : vector<1x8x8xi1> to vector<1x8x8xi1>
    %14 = vector.broadcast %13 : vector<1x8x8xi1> to vector<2x8x8xi1>
    %15 = vector.broadcast %cst_11 : f32 to vector<2x8x8xf32>
    %16 = arith.select %14, %6, %15 : vector<2x8x8xi1>, vector<2x8x8xf32>
    %cst_12 = arith.constant dense<0xFF800000> : vector<2x8xf32>
    %17 = vector.multi_reduction <maximumf>, %16, %cst_12 [2] : vector<2x8x8xf32> to vector<2x8xf32>
    %18 = vector.shape_cast %17 : vector<2x8xf32> to vector<2x8x1xf32>
    %19 = vector.broadcast %18 : vector<2x8x1xf32> to vector<2x8x8xf32>
    %20 = arith.subf %16, %19 : vector<2x8x8xf32>
    %21 = math.exp %20 : vector<2x8x8xf32>
    %cst_13 = arith.constant dense<0.000000e+00> : vector<2x8xf32>
    %22 = vector.multi_reduction <add>, %21, %cst_13 [2] : vector<2x8x8xf32> to vector<2x8xf32>
    %23 = vector.shape_cast %22 : vector<2x8xf32> to vector<2x8x1xf32>
    %24 = tpu.reciprocal %23 {approx = true} : vector<2x8x1xf32> -> vector<2x8x1xf32>
    %25 = vector.broadcast %24 : vector<2x8x1xf32> to vector<2x8x8xf32>
    %26 = arith.mulf %21, %25 : vector<2x8x8xf32>
    %27 = arith.truncf %26 : vector<2x8x8xf32> to vector<2x8x8xbf16>
    "tpu.trace_start"() <{level = 10 : i32, message = "hqk,hkd->hqd"}> : () -> ()
    %cst_14 = arith.constant dense<0.000000e+00> : vector<2x8x16xf32>
    %28 = tpu.matmul %27, %5, %cst_14 {dimension_numbers = #tpu.dot_dimension_numbers<[2], [1], [1], [2], [0, 0, 0, 1, 1, 2], [0], [0]>} : vector<2x8x8xbf16>, vector<2x8x16xbf16>, vector<2x8x16xf32> -> vector<2x8x16xf32>
    "tpu.trace_stop"() : () -> ()
    %29 = vector.extract_strided_slice %28 {offsets = [0, 0, 0], sizes = [1, 8, 16], strides = [1, 1, 1]} : vector<2x8x16xf32> to vector<1x8x16xf32>
    %30 = vector.shape_cast %29 : vector<1x8x16xf32> to vector<8x16xf32>
    %c0_15 = arith.constant 0 : index
    %c0_16 = arith.constant 0 : index
    %c0_17 = arith.constant 0 : index
    %31 = vector.load %arg5[%c0_15, %c0_16, %c0_17] : memref<1x8x32xf32, #tpu.memory_space<vmem>>, vector<1x8x16xf32>
    %32 = vector.shape_cast %31 : vector<1x8x16xf32> to vector<8x16xf32>
    %33 = vector.shape_cast %30 : vector<8x16xf32> to vector<1x8x16xf32>
    tpu.vector_store %arg5[%c0_15, %c0_16, %c0_17], %33 {strides = array<i32>} : memref<1x8x32xf32, #tpu.memory_space<vmem>>, vector<1x8x16xf32>,
    %34 = vector.extract_strided_slice %28 {offsets = [1, 0, 0], sizes = [1, 8, 16], strides = [1, 1, 1]} : vector<2x8x16xf32> to vector<1x8x16xf32>
    %35 = vector.shape_cast %34 : vector<1x8x16xf32> to vector<8x16xf32>
    %c0_18 = arith.constant 0 : index
    %c0_19 = arith.constant 0 : index
    %c16 = arith.constant 16 : index
    %36 = vector.load %arg5[%c0_18, %c0_19, %c16] : memref<1x8x32xf32, #tpu.memory_space<vmem>>, vector<1x8x16xf32>
    %37 = vector.shape_cast %36 : vector<1x8x16xf32> to vector<8x16xf32>
    %38 = vector.shape_cast %35 : vector<8x16xf32> to vector<1x8x16xf32>
    tpu.vector_store %arg5[%c0_18, %c0_19, %c16], %38 {strides = array<i32>} : memref<1x8x32xf32, #tpu.memory_space<vmem>>, vector<1x8x16xf32>,
    return
  }
  func.func @transform_0(%arg0: i32, %arg1: i32) -> (i32, i32, i32, i32) {
    %c0_i32 = arith.constant 0 : i32
    %c0_i32_0 = arith.constant 0 : i32
    %c0_i32_1 = arith.constant 0 : i32
    return %arg0, %c0_i32, %arg1, %c0_i32_0 : i32, i32, i32, i32
  }
  func.func @transform_1(%arg0: i32, %arg1: i32) -> (i32, i32, i32, i32) {
    %c0_i32 = arith.constant 0 : i32
    %c0_i32_0 = arith.constant 0 : i32
    %c0_i32_1 = arith.constant 0 : i32
    %c0_i32_2 = arith.constant 0 : i32
    return %arg0, %c0_i32, %c0_i32_0, %c0_i32_1 : i32, i32, i32, i32
  }
  func.func @transform_2(%arg0: i32, %arg1: i32) -> (i32, i32, i32, i32) {
    %c0_i32 = arith.constant 0 : i32
    %c0_i32_0 = arith.constant 0 : i32
    %c0_i32_1 = arith.constant 0 : i32
    %c0_i32_2 = arith.constant 0 : i32
    return %arg0, %c0_i32, %c0_i32_0, %c0_i32_1 : i32, i32, i32, i32
  }
  func.func @transform_3(%arg0: i32, %arg1: i32) -> (i32, i32, i32) {
    %c0_i32 = arith.constant 0 : i32
    %c0_i32_0 = arith.constant 0 : i32
    return %arg0, %arg1, %c0_i32 : i32, i32, i32
  }
}

</mosaic_0001>

<bundles_post_ra>
// kernel: tpu_custom_call.1
= control target key start
LH: loop header
LB: loop body
LE: loop exit
PB: predicated region body
PF: predicated region fallthrough
CT: control target
= control target key end

     0   :  { %s1232_s0 = inlined_call_operand.hbm [shape: bf16[2,2,8,16], index: 0, kind: input, shape index: {}]   ;;  %s1233_s1 = inlined_call_operand.hbm [shape: bf16[2,2,8,16], index: 1, kind: input, shape index: {}]   ;;  %s1234_s2 = inlined_call_operand.hbm [shape: bf16[2,2,8,16], index: 2, kind: input, shape index: {}]   ;;  %s1235_s3 = inlined_call_operand.hbm [shape: f32[2,8,32], index: 3, kind: output, shape index: {}]  }
   0x1   :  { %1241 = sst [smem:[#allocation15_spill]] %s1233_s1 }
   0x2   :  { %8 = vsyncpa [#allocation3], 0 }
   0x3   :  { %10 = vsyncpa [#allocation3 + $0x1], 0 }
   0x4   :  { %11 = vsyncpa [#allocation6], 0 }
   0x5   :  { %13 = vsyncpa [#allocation6 + $0x1], 0 }
   0x6   :  { %14 = vsyncpa [#allocation4], 0 }
   0x7   :  { %16 = vsyncpa [#allocation4 + $0x1], 0  ;;  %s1004_s12 = smov 0   ;;  %s1006_s13 = smov 0  }
   0x8   :  { %s1008_s14 = smov 0   ;;  %s1010_s15 = smov 0  }
   0x9   :  { %s1012_s16 = smov 0   ;;  %s1014_s17 = smov 0  }
   0xa LB: > { %1242 = sst [smem:[#allocation12_spill]] %s969_s16  ;;  %s1035_s18 = sadd.s32 4294967295, %s973_s17   ;;  %s973_s17 = sphi %s1014_s17, %s22_s17   ;;  %s969_s16 = sphi %s1012_s16, %s1257_s16   ;;  %s965_s15 = sphi %s1010_s15, %s1256_s15   ;;  %s961_s14 = sphi %s1008_s14, %s1260_s14   ;;  %s957_s13 = sphi %s1006_s13, %s1259_s13   ;;  %s953_s12 = sphi %s1004_s12, %s1258_s12  }
   0xb   : > { %s660_s19 = sadd.s32 4294967294, %s973_s17   ;;  %s34_s20 = sadd.s32 1, %s969_s16 }
   0xc   : > { %s43_s21 = sadd.s32 1, %s961_s14  ;;  %p36_p0 = scmp.ge.s32.totalorder %s34_s20, 2 }
   0xd   : > { %p50_p1 = scmp.ne.s32.totalorder %s961_s14, %s957_s13  ;;  %p51_p2 = scmp.eq.s32.totalorder %s973_s17, 0 }
   0xe   : > { %p56_p3 = scmp.ne.s32.totalorder %s957_s13, %s953_s12  ;;  %s1262_s20 = smov (%p36_p0, %s34_s20), 0 }
   0xf   : > { %1243 = sst [smem:[#allocation13_spill]] %s1262_s20  ;;  %p1047_p4 = por %p51_p2, %p50_p1 }
  0x10   : > { %p57_p5 = scmp.eq.s32.totalorder %s1035_s18, 0  ;;  %s38_s23 = ssub.s32 %s969_s16, %s1262_s20 }
  0x11   : > { %p134_p6 = scmp.eq.s32.totalorder %s1035_s18, 1  ;;  %p41_p7 = scmp.eq.s32.totalorder %s38_s23, 0 }
  0x12   : > { %p1055_p8 = por %p57_p5, %p56_p3  ;;  %p140_p10 = scmp.eq.s32.totalorder %s660_s19, 1 }
  0x13   : > { %p1059_p9 = por %p134_p6, %p50_p1  ;;  %p742_p13 = scmp.lt.s32.totalorder %s973_s17, 2 }
  0x14   : > { %s1064_s26 = scalar_select %p41_p7, %s961_s14, %s43_s21  }
  0x15   : > { %p1066_p11 = por %p140_p10, %p56_p3  ;;  %s1236_s28 = sand.u32 1, %s961_s14  }
  0x16   : > { %1247 = sst [smem:[#allocation14_spill]] %s1064_s26  ;;  %s1075_s29 = sshll.u32 %s1236_s28, 3 }
  0x17   : > { %s1078_s30 = sshll.u32 %s969_s16, 7  ;;  %p1082_p0 = pnand %p742_p13, %p1047_p4 }
  0x18   : > { %s182_s5 = sand.u32 1, %s973_s17   ;;  %s1250_s1 = sld [smem:[#allocation15_spill]] }
  0x19   : > { %s186_s9 = scalar_lea.vmem [#allocation5], %s1075_s29  ;;  %p672_p1 = scmp.ge.s32.totalorder %s973_s17, 1 }
  0x1a   : > { %s193_s10 = sshll.u32 %s186_s9, 4  ;;  %p222_p2 = scmp.lt.s32.totalorder %s973_s17, 3  ;;  %s194_s10 = int_to_ptr.vmem [resolvable:$true] %s193_s10 }
  0x1b   : > { %s1094_s11 = scalar_lea.sflag [#allocation6], %s182_s5  ;;  %p807_p3 = pneg %p1082_p0 }
  0x1c   : > { %s818_s19 = scalar_lea.vmem %s194_s10, 128  ;;  %s975_s21 = smov [#allocation5]  }
  0x1d   : > { %p819_p4 = scmp.ne.s32.totalorder %s194_s10, %s818_s19  ;;  %s823_s22 = sshll.u32 %s975_s21, 4  ;;  %s824_s22 = int_to_ptr.vmem [resolvable:$false] %s823_s22 }
  0x1e   : > { %s192_s8 = scalar_lea.hbm %s1250_s1, %s1078_s30  ;;  %s825_s23 = scalar_lea.vmem %s824_s22, 256 }
  0x1f   : > { %p821_p5 = pnand %p819_p4, %p807_p3  ;;  %p826_p7 = scmp.lt.s32.totalorder %s194_s10, %s824_s22 }
  0x20   : > { %p827_p10 = scmp.lt.s32.totalorder %s825_s23, %s818_s19 }
  0x21   : > { %p822_p6 = pneg %p821_p5 }
  0x22   : > { %p828_p13 = por %p827_p10, %p826_p7 }
  0x24   : > { %p829_p12 = pnand %p828_p13, %p822_p6 }
  0x26   : > { %832 = shalt.err (!%p829_p12)
}
  0x27   : > { %s1239_s6 = smov 64   ;;  %s977_s5 = smov 4  }
  0x28   : > { %734 = dma.hbm_to_vmem [thread:$0]  (!%p1082_p0), %s192_s8, 128, %s194_s10, %s1094_s11, %s1239_s6, %s1239_s6, %s977_s5  }
  0x29   : > { %p1111_p4 = pnand %p672_p1, %p222_p2  ;;  %s171_s21 = scalar_lea.hbm %s1232_s0, %s1078_s30 }
  0x2a   : > { %s164_s22 = scalar_lea.vmem [#allocation2], %s1075_s29  ;;  %s213_s20 = scalar_lea.hbm %s1234_s2, %s1078_s30 }
  0x2b   : > { %s172_s23 = sshll.u32 %s164_s22, 4  ;;  %s1252_s16 = sand.u32 1, %s961_s14   ;;  %s173_s23 = int_to_ptr.vmem [resolvable:$true] %s172_s23 }
  0x2c   : > { %s161_s26 = scalar_lea.sflag [#allocation3], %s1252_s16  ;;  %s846_s8 = scalar_lea.vmem %s173_s23, 128 }
  0x2d   : > { %p847_p12 = scmp.ne.s32.totalorder %s173_s23, %s846_s8  ;;  %s978_s10 = smov [#allocation2]  }
  0x2e   : > { %s851_s6 = sshll.u32 %s978_s10, 4  ;;  %s852_s6 = int_to_ptr.vmem [resolvable:$false] %s851_s6 }
  0x2f   : > { %p849_p1 = pnand %p847_p12, %p807_p3  ;;  %s853_s9 = scalar_lea.vmem %s852_s6, 256 }
  0x30   : > { %p854_p5 = scmp.lt.s32.totalorder %s173_s23, %s852_s6  ;;  %p855_p6 = scmp.lt.s32.totalorder %s853_s9, %s846_s8 }
  0x31   : > { %p850_p2 = pneg %p849_p1 }
  0x32   : > { %p856_p7 = por %p855_p6, %p854_p5 }
  0x34   : > { %p857_p10 = pnand %p856_p7, %p850_p2 }
  0x36   : > { %860 = shalt.err (!%p857_p10)
}
  0x37   : > { %s1253_s1 = smov 64   ;;  %s207_s16 = scalar_lea.vmem [#allocation7], %s1075_s29 }
  0x38   : > { %731 = dma.hbm_to_vmem [thread:$0]  (!%p1082_p0), %s171_s21, 128, %s173_s23, %s161_s26, %s1253_s1, %s1253_s1, %s977_s5  }
  0x39   : > { %s214_s28 = sshll.u32 %s207_s16, 4  ;;  %s979_s6 = smov [#allocation7]   ;;  %s215_s28 = int_to_ptr.vmem [resolvable:$true] %s214_s28 }
  0x3a   : > { %s874_s19 = scalar_lea.vmem %s215_s28, 128  ;;  %s879_s22 = sshll.u32 %s979_s6, 4  ;;  %s880_s22 = int_to_ptr.vmem [resolvable:$false] %s879_s22 }
  0x3b   : > { %p875_p13 = scmp.ne.s32.totalorder %s215_s28, %s874_s19  ;;  %s881_s8 = scalar_lea.vmem %s880_s22, 256 }
  0x3c   : > { %p882_p2 = scmp.lt.s32.totalorder %s215_s28, %s880_s22  ;;  %p883_p5 = scmp.lt.s32.totalorder %s881_s8, %s874_s19 }
  0x3d   : > { %p877_p12 = pnand %p875_p13, %p807_p3 }
  0x3e   : > { %p884_p6 = por %p883_p5, %p882_p2 }
  0x3f   : > { %p878_p1 = pneg %p877_p12 }
  0x41   : > { %p885_p7 = pnand %p884_p6, %p878_p1 }
  0x43   : > { %888 = shalt.err (!%p885_p7)
}
  0x44   : > { %737 = dma.hbm_to_vmem [thread:$0]  (!%p1082_p0), %s213_s20, 128, %s215_s28, %s1094_s11, %s1253_s1, %s1253_s1, %s977_s5  }
  0x45   : > { %226 = sbr.rel (%p1111_p4) target bundleno = 917 (0x395), region = 32  ;;  %s1152_s21 = sand.u32 (!%p1111_p4), 1, %s957_s13  }
  0x46   : > { %s1155_s4 = sshll.u32 (!%p1111_p4), %s1152_s21, 3  ;;  %s229_s23 = scalar_lea.sflag (!%p1111_p4), [#allocation3], %s1152_s21 }
  0x47   : > { %s232_s10 = scalar_lea.vmem (!%p1111_p4), [#allocation2], %s1155_s4 }
  0x4a   : > { %940 = dma.done.wait (%p1055_p8), %s229_s23, 128  }
  0x4b   : > { %942 = vsyncadd (%p1055_p8), %s229_s23, 4294967168  ;;  %s237_s20 = sand.u32 1, %s1035_s18   ;;  %s241_s11 = scalar_lea.vmem [#allocation5], %s1155_s4 }
  0x4c   : > { %s238_s30 = scalar_lea.sflag [#allocation6], %s237_s20 }
  0x4d   : > { %944 = dma.done.wait (%p1055_p8), %s238_s30, 256  }
  0x4e   : > { %946 = vsyncadd (%p1055_p8), %s238_s30, 4294967040  ;;  %v980_v0 = vmov 0.0   ;;  %vm981_vm0 = vmmov 0   ;;  %vm290_vm1 = vcmask 130048   ;;  %v287_v1 = vld [vmem:[%s241_s11 + $0x4] sm:$0xf]  ;;  %v384_v7 = vlaneseq }
  0x4f   : > { %702 = vmatprep.subr.bf16.mxu1 %v980_v0  ;;  %696 = vmatprep.subr.bf16.mxu0 %v980_v0  ;;  %v286_v2 = vld [vmem:[%s241_s11] sm:$0xf]  ;;  %v341_v3 = vsel %vm290_vm1, %v287_v1, 0  ;;  %v285_v5 = vld [vmem:[%s232_s10 + $0x4] sm:$0xf]  ;;  %vm395_vm3 = vcmask 64512  }
  0x50   : > { %704 = vmatprep.mubr.msk.bf16.mxu1 %vm981_vm0, %v980_v0  ;;  %698 = vmatprep.mubr.msk.bf16.mxu0 %vm981_vm0, %v980_v0  ;;  %v295_v4 = vsel %vm290_vm1, %v286_v2, 0  ;;  %v284_v6 = vld [vmem:[%s232_s10] sm:$0xf]  ;;  %v385_v8 = vshrl.u32 %v384_v7, 7  ;;  %v389_v9 = vand.u32 127, %v384_v7  ;;  %vm423_vm4 = vcmask 1043456  }
  0x51   : > { %703 = vmatpush3.bf16.xpose.msra.mxu1 %v341_v3  ;;  %697 = vmatpush3.bf16.xpose.msra.mxu0 %v295_v4  ;;  %s250_s18 = scalar_lea.vmem [#allocation7], %s1155_s4  ;;  %s982_s24 = smov 16   ;;  %vm518_vm5 = vcmask 261248  }
  0x52   : > { %714 = vmatprep.subr.bf16.mxu1 %v980_v0  ;;  %708 = vmatprep.subr.bf16.mxu0 %v980_v0  ;;  %vm390_vm2 = vcmp.le.s32.totalorder %v389_v9, %v385_v8  ;;  %v289_v32 = vld [vmem:[%s250_s18 + $0x4] sm:$0xf]  ;;  %v288_v34 = vld [vmem:[%s250_s18] sm:$0xf]  ;;  %s282_s5 = scalar_lea.vmem [#allocation8], %s1155_s4  ;;  %s682_s7 = sshll.u32 %s965_s15, 7 }
  0x53   : > { %v471_v33 = vsel %vm423_vm4, %v289_v32, 0  ;;  %v425_v35 = vsel %vm423_vm4, %v288_v34, 0  ;;  %s535_s9 = sshll.u32 %s282_s5, 4  ;;  %s1190_s28 = scalar_lea.hbm %s1235_s3, %s682_s7  ;;  %s536_s9 = int_to_ptr.vmem [resolvable:$true] %s535_s9 }
  0x54   : > { %s521_s19 = scalar_lea.sflag [#allocation4], %s1152_s21  ;;  %s889_s6 = scalar_lea.vmem %s536_s9, 128 }
  0x55   : > { %p890_p8 = scmp.ne.s32.totalorder %s536_s9, %s889_s6  ;;  %s983_s22 = smov [#allocation8]  }
  0x56   : > { %s893_s8 = sshll.u32 %s983_s22, 4  ;;  %s894_s8 = int_to_ptr.vmem [resolvable:$false] %s893_s8 }
  0x57   : > { %p891_p0 = pnand %p890_p8, %p1059_p9  ;;  %s895_s15 = scalar_lea.vmem %s894_s8, 256 }
  0x58   : > { %705 = vmatmul.mubr.msk.bf16.vlgmr.msra.gmra.mxu1 %vm290_vm1, %v285_v5  ;;  %699 = vmatmul.mubr.msk.bf16.vlgmr.msra.gmra.mxu0 %vm290_vm1, %v284_v6  ;;  %p896_p4 = scmp.lt.s32.totalorder %s536_s9, %s894_s8  ;;  %p897_p10 = scmp.lt.s32.totalorder %s895_s15, %s889_s6 }
  0x59   : > { %716 = vmatprep.mubr.msk.bf16.mxu1 %vm981_vm0, %v980_v0  ;;  %710 = vmatprep.mubr.msk.bf16.mxu0 %vm981_vm0, %v980_v0  ;;  %p892_p3 = pneg %p891_p0 }
  0x5a   : > { %715 = vmatpush3.bf16.msra.mxu1 %v471_v33  ;;  %709 = vmatpush3.bf16.msra.mxu0 %v425_v35  ;;  %p898_p13 = por %p897_p10, %p896_p4 }
  0x5c   : > { %p899_p12 = pnand %p898_p13, %p892_p3 }
 0x118   : > { %v377_v10 = vpop.f32.mrf.mxu1  ;;  %v331_v11 = vpop.f32.mrf.mxu0 }
 0x119   : > { %v394_v12 = vsel %vm390_vm2, %v377_v10, -inf  ;;  %v393_v13 = vsel %vm390_vm2, %v331_v11, -inf }
 0x11a   : > { %v706_v14 = vpop.f32.mrf.mxu1  ;;  %v399_v15 = vsel %vm395_vm3, %v394_v12, -inf  ;;  %v700_v16 = vpop.f32.mrf.mxu0  ;;  %v396_v18 = vsel %vm395_vm3, %v393_v13, -inf }
 0x11b   : > { %400 = vmax.xlane.f32.xlu0 %v399_v15 }
 0x11c   : > { %v380_v17 = vpop.f32.mrf.mxu1  ;;  %v334_v19 = vpop.f32.mrf.mxu0 }
 0x11e   : > { %v707_v20 = vpop.f32.mrf.mxu1  ;;  %v701_v21 = vpop.f32.mrf.mxu0 }
 0x11f   : > { %397 = vmax.xlane.f32.xlu0 %v396_v18 }
 0x1a4   : > { %v401_v22 = vpop.xlane.xlu0 %400 }
 0x1a5   : > { %v403_v23 = vsub.f32 %v394_v12, %v401_v22 }
 0x1a7   : > { %v406_v24 = vmul.f32 1.442695, %v403_v23 }
 0x1a8   : > { %v398_v25 = vpop.xlane.xlu0 %397 }
 0x1a9   : > { %797 = vpow2.f32 %v406_v24  ;;  %v402_v26 = vsub.f32 %v393_v13, %v398_v25 }
 0x1ab   : > { %v404_v27 = vmul.f32 1.442695, %v402_v26 }
 0x1ad   : > { %799 = vpow2.f32 %v404_v27 }
 0x1b6   : > { %v798_v28 = vpop.eup %797 }
 0x1b7   : > { %v411_v29 = vsel %vm395_vm3, %v798_v28, 0.0 }
 0x1b8   : > { %412 = vadd.xlane.f32.xlu1 %v411_v29 }
 0x1ba   : > { %v800_v30 = vpop.eup %799 }
 0x1bb   : > { %v408_v31 = vsel %vm395_vm3, %v800_v30, 0.0 }
 0x1bc   : > { %409 = vadd.xlane.f32.xlu1 %v408_v31 }
 0x241   : > { %v413_v36 = vpop.xlane.xlu1 %412 }
 0x242   : > { %801 = vrcp.f32 %v413_v36 }
 0x245   : > { %v410_v37 = vpop.xlane.xlu1 %409 }
 0x246   : > { %803 = vrcp.f32 %v410_v37 }
 0x24f   : > { %v802_v38 = vpop.eup %801 }
 0x250   : > { %v417_v39 = vmul.f32 %v802_v38, %v798_v28 }
 0x252   : > { %v419_v40 = vpack.c.bf16 %v417_v39, %v417_v39 }
 0x253   : > { %v804_v41 = vpop.eup %803 }
 0x254   : > { %717 = vmatmul.mubr.msk.bf16.vlgmr.msra.gmra.mxu1 %vm395_vm3, %v419_v40  ;;  %v416_v42 = vmul.f32 %v804_v41, %v800_v30 }
 0x256   : > { %v418_v43 = vpack.c.bf16 %v416_v42, %v416_v42 }
 0x258   : > { %711 = vmatmul.mubr.msk.bf16.vlgmr.msra.gmra.mxu0 %vm395_vm3, %v418_v43 }
 0x314   : > { %v507_v44 = vpop.f32.mrf.mxu1 }
 0x315   : > { %515 = vrot.lane.b32.xlu0 %v507_v44, %s982_s24 }
 0x316   : > { %v718_v45 = vpop.f32.mrf.mxu1 }
 0x318   : > { %v461_v46 = vpop.f32.mrf.mxu0  ;;  %v510_v47 = vpop.f32.mrf.mxu1 }
 0x319   : > { %513 = vst.msk [vmem:[%s282_s5] sm:$0xff] %vm290_vm1, %v461_v46 }
 0x31a   : > { %v712_v48 = vpop.f32.mrf.mxu0  ;;  %v719_v49 = vpop.f32.mrf.mxu1 }
 0x31c   : > { %v464_v50 = vpop.f32.mrf.mxu0 }
 0x31e   : > { %v713_v51 = vpop.f32.mrf.mxu0 }
 0x387   : > { %v516_v52 = vpop.permute.xlu0 %515 }
 0x388   : > { %519 = vst.msk [vmem:[%s282_s5] sm:$0xff] %vm518_vm5, %v516_v52 }
 0x389   : > { %902 = shalt.err (!%p899_p12)
}
 0x38a   : > { %s903_s26 = scalar_lea.hbm %s1190_s28, 128  ;;  %s907_s4 = scalar_lea.hbm %s1235_s3, 256 }
 0x38b   : > { %p904_p1 = scmp.ne.s32.totalorder %s1190_s28, %s903_s26  ;;  %p908_p6 = scmp.lt.s32.totalorder %s1190_s28, %s1235_s3 }
 0x38c   : > { %p909_p7 = scmp.lt.s32.totalorder %s907_s4, %s903_s26 }
 0x38d   : > { %p905_p2 = pnand %p904_p1, %p1059_p9 }
 0x38e   : > { %p910_p8 = por %p909_p7, %p908_p6 }
 0x38f   : > { %p906_p5 = pneg %p905_p2 }
 0x391   : > { %p911_p0 = pnand %p910_p8, %p906_p5 }
 0x393   : > { %914 = shalt.err (!%p911_p0)
}
 0x394   : > { %726 = dma.vmem_to_hbm [thread:$0]  (%p1059_p9), %s536_s9, 128, %s1190_s28, %s521_s19  }
 0x395 PF: > { %s547_s20 = sand.u32 1, %s953_s12   ;;  %p1254_p3 = scmp.ge.s32.totalorder %s973_s17, 2 }
 0x396   : > { %s548_s30 = scalar_lea.sflag [#allocation4], %s547_s20 }
 0x397   : > { %p739_p4 = pnand %p1254_p3, %p1066_p11 }
 0x399   : > { %p740_p10 = pneg %p739_p4 }
 0x39b   : > { %948 = dma.done.wait (%p740_p10), %s548_s30, 128  }
 0x39c   : > { %950 = vsyncadd (%p740_p10), %s548_s30, 4294967168  ;;  %s22_s17 = sadd.s32 1, %s973_s17   ;;  %s1255_s25 = sld [smem:[#allocation14_spill]] }
 0x39d   : > { %p19_p13 = scmp.ge.s32.totalorder %s22_s17, 4   ;;  %s1256_s15 = sld [smem:[#allocation12_spill]] }
 0x39e   : > { %s1257_s16 = sld [smem:[#allocation13_spill]]  ;;  %s1258_s12 = smov %s957_s13 }
 0x39f   : > { %s1259_s13 = smov %s961_s14  ;;  %21 = sbr.rel (!%p19_p13) target bundleno = 10 (0xa), region = 101 }
 0x3a2   : > { %s1260_s14 = smov %s1255_s25 }
 0x3a4   :  { %553 = vsyncpa [#allocation3], 1 }
 0x3a5   :  { %555 = vsyncpa [#allocation3 + $0x1], 1 }
 0x3a6   :  { %556 = vsyncpa [#allocation6], 1 }
 0x3a7   :  { %558 = vsyncpa [#allocation6 + $0x1], 1 }
 0x3a8   :  { %559 = vsyncpa [#allocation4], 1 }
 0x3a9   :  { %561 = vsyncpa [#allocation4 + $0x1], 1 }

</bundles_post_ra>
